<compile_context>
chip_gen: v7x
topology: tpu7x:2x2x1
jax: 0.10.0
libtpu: 0.0.40
codegen_flags: <defaults>
</compile_context>

<pallas_src>
import numpy as np
import jax
import jax.numpy as jnp
from jax.experimental import pallas as pl
from jax.experimental.pallas import tpu as pltpu

# ---- static configuration (small, synthetic, consistent with the block) ----
N = 2               # batch
CIN = 4             # in_channels
COUT = 8            # out_channels
KS = 3              # conv kernel_size
GROUPS = 2          # groups_conv (block default)
P = 2               # kernel_size_pooling
HIN = WIN = 18      # input spatial -> conv output 16x16 (= Dft2d width/height)
HO = HIN - KS + 1   # 16
WO = WIN - KS + 1   # 16
HP = HO // P        # 8
WP = WO // P        # 8
S = HO * WO         # 256  (lane-dense spatial)
SP = HP * WP        # 64   (pooled spatial)
KK = KS * KS        # 9
NCO = N * COUT      # 16   (batch fused onto the matmul M dim)
KPAT = 80           # im2col K: 72 patch rows + 1 ones (bias) + 7 zero pad
K1 = 56             # 1x1-conv K: 48 pooled rows + 1 ones (bias) + 7 zero pad


# ---------------------------- Pallas kernel ---------------------------------
def fourier_block_kernel(patch_ref, wc_ref, mr_ref, mi_ref, biaspad_ref,
                         sel_ref, w1_ref, out_ref):
    # grouped KxK conv + bias: one lane-dense matmul (bias via the ones row)
    y = jnp.dot(wc_ref[...], patch_ref[...],
                preferred_element_type=jnp.float32)            # (16, 256)

    # fixed 2-D DFT (full precomputed basis), real & imag parts
    re = jnp.dot(y, mr_ref[...], preferred_element_type=jnp.float32)  # (16, 256)
    im = jnp.dot(y, mi_ref[...], preferred_element_type=jnp.float32)  # (16, 256)

    # channel concat on rows + a constant ones row that carries the 1x1 bias
    # through the (max) pooling stage. rows = [re | im | conv | ones | 0-pad]
    cat = jnp.concatenate([re, im, y, biaspad_ref[...]], axis=0)       # (56, 256)

    # 2x2/2 max pool: each 0/1 selector picks one corner of every 2x2 window
    # and compacts 256 -> 64 lanes on the MXU; 3 elementwise maxes finish it.
    p00 = jnp.dot(cat, sel_ref[0], preferred_element_type=jnp.float32)  # (56, 64)
    p01 = jnp.dot(cat, sel_ref[1], preferred_element_type=jnp.float32)
    p10 = jnp.dot(cat, sel_ref[2], preferred_element_type=jnp.float32)
    p11 = jnp.dot(cat, sel_ref[3], preferred_element_type=jnp.float32)
    pooled = jnp.maximum(jnp.maximum(p00, p01), jnp.maximum(p10, p11))  # (56, 64)

    # 1x1 conv (groups=1) over the 3*COUT pooled channels, batch fused,
    # bias folded in via the pooled ones row.
    out_ref[...] = jnp.dot(w1_ref[...], pooled,
                           preferred_element_type=jnp.float32)          # (16, 64)


# ---------------------------- wrapper ----------------------------------------
def _im2col(x):
    """Build the (KPAT, S) conv patch matrix in XLA (outside the kernel)."""
    slabs = []
    for dy in range(KS):
        for dx in range(KS):
            win = x[:, :, dy:dy + HO, dx:dx + WO]         # (N, CIN, HO, WO)
            slabs.append(win.reshape(N * CIN, S))
    patch = jnp.concatenate(slabs, axis=0)                # (72, 256)
    ones = jnp.ones((1, S), jnp.float32)                  # bias row
    zpad = jnp.zeros((KPAT - KK * N * CIN - 1, S), jnp.float32)
    return jnp.concatenate([patch, ones, zpad], axis=0)   # (80, 256)


@jax.jit
def fourier_block(x, wc_aug, mr, mi, biaspad, sel, w1_aug):
    patch = _im2col(x.astype(jnp.float32))
    out = pl.pallas_call(
        fourier_block_kernel,
        out_shape=jax.ShapeDtypeStruct((NCO, SP), jnp.float32),
        grid_spec=pltpu.PrefetchScalarGridSpec(
            num_scalar_prefetch=0,
            grid=(1,),
            in_specs=[
                pl.BlockSpec((KPAT, S), lambda i: (0, 0)),      # patch
                pl.BlockSpec((NCO, KPAT), lambda i: (0, 0)),    # conv weight
                pl.BlockSpec((S, S), lambda i: (0, 0)),         # DFT real basis
                pl.BlockSpec((S, S), lambda i: (0, 0)),         # DFT imag basis
                pl.BlockSpec((8, S), lambda i: (0, 0)),         # ones/zero rows
                pl.BlockSpec((4, S, SP), lambda i: (0, 0, 0)),  # pool selectors
                pl.BlockSpec((NCO, K1), lambda i: (0, 0)),      # 1x1 weight
            ],
            out_specs=pl.BlockSpec((NCO, SP), lambda i: (0, 0)),
        ),
        compiler_params=pltpu.CompilerParams(
            dimension_semantics=("arbitrary",)),
    )(patch, wc_aug, mr, mi, biaspad, sel, w1_aug)
    return out.reshape(N, COUT, HP, WP)                   # pure reshape, no transpose


# ---------------------------- parameter packing (host, tiny) -----------------
def _dft2_matrices(h, w):
    """Full 2-D DFT bases: Mr[s,s'] = cos(ang), Mi[s,s'] = -sin(ang) so that
    fft2(y)[u,v] = sum_s y[s]*(Mr + i*Mi)[s, (u,v)]."""
    hh = np.arange(h, dtype=np.float64)
    ww = np.arange(w, dtype=np.float64)
    ang_h = 2.0 * np.pi * np.outer(hh, hh) / h            # (h, h): row h, col u
    ang_w = 2.0 * np.pi * np.outer(ww, ww) / w            # (w, w): row w, col v
    ang = (ang_h[:, None, :, None] + ang_w[None, :, None, :]).reshape(h * w, h * w)
    return np.cos(ang).astype(np.float32), (-np.sin(ang)).astype(np.float32)


def pack_params(wconv, bconv, w1, b1):
    cpg_out, cpg_in = COUT // GROUPS, CIN // GROUPS
    # dense (ungrouped) conv weight
    wdense = np.zeros((COUT, CIN, KS, KS), np.float32)
    for co in range(COUT):
        g = co // cpg_out
        wdense[co, g * cpg_in:(g + 1) * cpg_in] = wconv[co]

    # conv as one im2col matmul, batch fused block-diagonally, bias folded in,
    # K padded 73 -> 80.  patch row order: (dy, dx, n, ci).
    wc_aug = np.zeros((NCO, KPAT), np.float32)
    for n in range(N):
        for co in range(COUT):
            r = n * COUT + co
            for dy in range(KS):
                for dx in range(KS):
                    base = (dy * KS + dx) * (N * CIN) + n * CIN
                    wc_aug[r, base:base + CIN] = wdense[co, :, dy, dx]
            wc_aug[r, KK * N * CIN] = bconv[co]           # ones-row column (72)

    # full 2-D DFT bases (256x256 each, ~512 KiB total: trivially VMEM-resident)
    mr, mi = _dft2_matrices(HO, WO)

    # constant rows appended to cat: row 0 = ones (carries the 1x1 bias through
    # max pooling), rows 1..7 = zeros (sublane padding to a multiple of 8).
    biaspad = np.zeros((8, S), np.float32)
    biaspad[0, :] = 1.0

    # 2x2 max-pool corner selectors: sel[k] maps spatial lane
    # (2*ph+dh)*WO + (2*pw+dw) -> pooled lane ph*WP + pw, with (dh,dw)=k.
    sel = np.zeros((4, S, SP), np.float32)
    for k in range(4):
        dh, dw = k // 2, k % 2
        for ph in range(HP):
            for pw in range(WP):
                sel[k, (P * ph + dh) * WO + (P * pw + dw), ph * WP + pw] = 1.0

    # 1x1 conv (groups=1) on the pooled concat, batch fused, bias folded in,
    # K padded 49 -> 56.  cat row order: [re(n,ci) | im(n,ci) | conv(n,ci) | 1 | 0pad]
    w1m = w1[:, :, 0, 0]                                  # (COUT, 3*COUT)
    w1_aug = np.zeros((NCO, K1), np.float32)
    for n in range(N):
        for co in range(COUT):
            r = n * COUT + co
            for ci in range(COUT):
                w1_aug[r, 0 * NCO + n * COUT + ci] = w1m[co, ci]               # real
                w1_aug[r, 1 * NCO + n * COUT + ci] = w1m[co, COUT + ci]        # imag
                w1_aug[r, 2 * NCO + n * COUT + ci] = w1m[co, 2 * COUT + ci]    # conv
            w1_aug[r, 3 * NCO] = b1[co]                   # ones-row column (48)

    return (jnp.asarray(wc_aug), jnp.asarray(mr), jnp.asarray(mi),
            jnp.asarray(biaspad), jnp.asarray(sel), jnp.asarray(w1_aug))


# ---------------------------- pure-JAX reference ------------------------------
def reference(x, wconv, bconv, w1, b1):
    hi = jax.lax.Precision.HIGHEST
    y = jax.lax.conv_general_dilated(
        x, wconv, window_strides=(1, 1), padding="VALID",
        dimension_numbers=("NCHW", "OIHW", "NCHW"),
        feature_group_count=GROUPS, precision=hi) + bconv[None, :, None, None]
    f = jnp.fft.fft2(y)                                   # standard 2-D DFT
    cat = jnp.concatenate([jnp.real(f), jnp.imag(f), y], axis=1)
    pooled = jax.lax.reduce_window(cat, -jnp.inf, jax.lax.max,
                                   (1, 1, P, P), (1, 1, P, P), "VALID")
    out = jax.lax.conv_general_dilated(
        pooled, w1, window_strides=(1, 1), padding="VALID",
        dimension_numbers=("NCHW", "OIHW", "NCHW"),
        feature_group_count=1, precision=hi) + b1[None, :, None, None]
    return out


if __name__ == "__main__":
    key = jax.random.PRNGKey(0)
    ks = jax.random.split(key, 5)
    x = jax.random.normal(ks[0], (N, CIN, HIN, WIN), jnp.float32)
    wconv = 0.1 * jax.random.normal(ks[1], (COUT, CIN // GROUPS, KS, KS), jnp.float32)
    bconv = 0.1 * jax.random.normal(ks[2], (COUT,), jnp.float32)
    w1 = 0.1 * jax.random.normal(ks[3], (COUT, 3 * COUT, 1, 1), jnp.float32)
    b1 = 0.1 * jax.random.normal(ks[4], (COUT,), jnp.float32)

    params = pack_params(np.asarray(wconv), np.asarray(bconv),
                         np.asarray(w1), np.asarray(b1))

    out = jax.block_until_ready(fourier_block(x, *params))
    ref = jax.block_until_ready(reference(x, wconv, bconv, w1, b1))

    assert out.shape == (N, COUT, HP, WP), out.shape
    err = float(jnp.max(jnp.abs(out - ref)) / (1e-6 + float(jnp.max(jnp.abs(ref)))))
    assert err < 2e-2, f"mismatch vs reference, normalized max err = {err}"
    print("KERNEL_OK")
</pallas_src>

<mosaic_0001>
module attributes {stable_mosaic.version = 11 : i64} {
  func.func @fourier_block_kernel(%arg0: i32, %arg1: memref<80x256xf32, #tpu.memory_space<vmem>>, %arg2: memref<16x80xf32, #tpu.memory_space<vmem>>, %arg3: memref<256x256xf32, #tpu.memory_space<vmem>>, %arg4: memref<256x256xf32, #tpu.memory_space<vmem>>, %arg5: memref<8x256xf32, #tpu.memory_space<vmem>>, %arg6: memref<4x256x64xf32, #tpu.memory_space<vmem>>, %arg7: memref<16x56xf32, #tpu.memory_space<vmem>>, %arg8: memref<16x64xf32, #tpu.memory_space<vmem>>) attributes {dimension_semantics = [#tpu.dimension_semantics<arbitrary>], iteration_bounds = array<i64: 1>, scalar_prefetch = 0 : i64, scratch_operands = 0 : i64, tpu.core_type = #tpu.core_type<tc>, window_params = [{pipeline_mode = #tpu.pipeline_mode<synchronous>, transform_indices = @transform_0, window_bounds = array<i64: 80, 256>}, {pipeline_mode = #tpu.pipeline_mode<synchronous>, transform_indices = @transform_1, window_bounds = array<i64: 16, 80>}, {pipeline_mode = #tpu.pipeline_mode<synchronous>, transform_indices = @transform_2, window_bounds = array<i64: 256, 256>}, {pipeline_mode = #tpu.pipeline_mode<synchronous>, transform_indices = @transform_3, window_bounds = array<i64: 256, 256>}, {pipeline_mode = #tpu.pipeline_mode<synchronous>, transform_indices = @transform_4, window_bounds = array<i64: 8, 256>}, {pipeline_mode = #tpu.pipeline_mode<synchronous>, transform_indices = @transform_5, window_bounds = array<i64: 4, 256, 64>}, {pipeline_mode = #tpu.pipeline_mode<synchronous>, transform_indices = @transform_6, window_bounds = array<i64: 16, 56>}, {pipeline_mode = #tpu.pipeline_mode<synchronous>, transform_indices = @transform_7, window_bounds = array<i64: 16, 64>}]} {
    %c0 = arith.constant 0 : index
    %c0_0 = arith.constant 0 : index
    %0 = vector.load %arg2[%c0, %c0_0] : memref<16x80xf32, #tpu.memory_space<vmem>>, vector<16x80xf32>
    %c0_1 = arith.constant 0 : index
    %c0_2 = arith.constant 0 : index
    %1 = vector.load %arg1[%c0_1, %c0_2] : memref<80x256xf32, #tpu.memory_space<vmem>>, vector<80x256xf32>
    %cst = arith.constant dense<0.000000e+00> : vector<16x256xf32>
    %2 = tpu.matmul %0, %1, %cst {dimension_numbers = #tpu.dot_dimension_numbers<[1], [0], [0], [1], [0, 0, 1, 1], [], []>} : vector<16x80xf32>, vector<80x256xf32>, vector<16x256xf32> -> vector<16x256xf32>
    %c0_3 = arith.constant 0 : index
    %c0_4 = arith.constant 0 : index
    %3 = vector.load %arg3[%c0_3, %c0_4] : memref<256x256xf32, #tpu.memory_space<vmem>>, vector<256x256xf32>
    %cst_5 = arith.constant dense<0.000000e+00> : vector<16x256xf32>
    %4 = tpu.matmul %2, %3, %cst_5 {dimension_numbers = #tpu.dot_dimension_numbers<[1], [0], [0], [1], [0, 0, 1, 1], [], []>} : vector<16x256xf32>, vector<256x256xf32>, vector<16x256xf32> -> vector<16x256xf32>
    %c0_6 = arith.constant 0 : index
    %c0_7 = arith.constant 0 : index
    %5 = vector.load %arg4[%c0_6, %c0_7] : memref<256x256xf32, #tpu.memory_space<vmem>>, vector<256x256xf32>
    %cst_8 = arith.constant dense<0.000000e+00> : vector<16x256xf32>
    %6 = tpu.matmul %2, %5, %cst_8 {dimension_numbers = #tpu.dot_dimension_numbers<[1], [0], [0], [1], [0, 0, 1, 1], [], []>} : vector<16x256xf32>, vector<256x256xf32>, vector<16x256xf32> -> vector<16x256xf32>
    %c0_9 = arith.constant 0 : index
    %c0_10 = arith.constant 0 : index
    %7 = vector.load %arg5[%c0_9, %c0_10] : memref<8x256xf32, #tpu.memory_space<vmem>>, vector<8x256xf32>
    %8 = tpu.concatenate %4, %6, %2, %7 in 0 : vector<16x256xf32>, vector<16x256xf32>, vector<16x256xf32>, vector<8x256xf32> -> vector<56x256xf32>
    %c0_11 = arith.constant 0 : index
    %c0_12 = arith.constant 0 : index
    %c0_13 = arith.constant 0 : index
    %9 = vector.load %arg6[%c0_11, %c0_12, %c0_13] : memref<4x256x64xf32, #tpu.memory_space<vmem>>, vector<1x256x64xf32>
    %10 = vector.shape_cast %9 : vector<1x256x64xf32> to vector<256x64xf32>
    %cst_14 = arith.constant dense<0.000000e+00> : vector<56x64xf32>
    %11 = tpu.matmul %8, %10, %cst_14 {dimension_numbers = #tpu.dot_dimension_numbers<[1], [0], [0], [1], [0, 0, 1, 1], [], []>} : vector<56x256xf32>, vector<256x64xf32>, vector<56x64xf32> -> vector<56x64xf32>
    %c1 = arith.constant 1 : index
    %c0_15 = arith.constant 0 : index
    %c0_16 = arith.constant 0 : index
    %12 = vector.load %arg6[%c1, %c0_15, %c0_16] : memref<4x256x64xf32, #tpu.memory_space<vmem>>, vector<1x256x64xf32>
    %13 = vector.shape_cast %12 : vector<1x256x64xf32> to vector<256x64xf32>
    %cst_17 = arith.constant dense<0.000000e+00> : vector<56x64xf32>
    %14 = tpu.matmul %8, %13, %cst_17 {dimension_numbers = #tpu.dot_dimension_numbers<[1], [0], [0], [1], [0, 0, 1, 1], [], []>} : vector<56x256xf32>, vector<256x64xf32>, vector<56x64xf32> -> vector<56x64xf32>
    %c2 = arith.constant 2 : index
    %c0_18 = arith.constant 0 : index
    %c0_19 = arith.constant 0 : index
    %15 = vector.load %arg6[%c2, %c0_18, %c0_19] : memref<4x256x64xf32, #tpu.memory_space<vmem>>, vector<1x256x64xf32>
    %16 = vector.shape_cast %15 : vector<1x256x64xf32> to vector<256x64xf32>
    %cst_20 = arith.constant dense<0.000000e+00> : vector<56x64xf32>
    %17 = tpu.matmul %8, %16, %cst_20 {dimension_numbers = #tpu.dot_dimension_numbers<[1], [0], [0], [1], [0, 0, 1, 1], [], []>} : vector<56x256xf32>, vector<256x64xf32>, vector<56x64xf32> -> vector<56x64xf32>
    %c3 = arith.constant 3 : index
    %c0_21 = arith.constant 0 : index
    %c0_22 = arith.constant 0 : index
    %18 = vector.load %arg6[%c3, %c0_21, %c0_22] : memref<4x256x64xf32, #tpu.memory_space<vmem>>, vector<1x256x64xf32>
    %19 = vector.shape_cast %18 : vector<1x256x64xf32> to vector<256x64xf32>
    %cst_23 = arith.constant dense<0.000000e+00> : vector<56x64xf32>
    %20 = tpu.matmul %8, %19, %cst_23 {dimension_numbers = #tpu.dot_dimension_numbers<[1], [0], [0], [1], [0, 0, 1, 1], [], []>} : vector<56x256xf32>, vector<256x64xf32>, vector<56x64xf32> -> vector<56x64xf32>
    %21 = arith.maximumf %11, %14 : vector<56x64xf32>
    %22 = arith.maximumf %17, %20 : vector<56x64xf32>
    %23 = arith.maximumf %21, %22 : vector<56x64xf32>
    %c0_24 = arith.constant 0 : index
    %c0_25 = arith.constant 0 : index
    %24 = vector.load %arg7[%c0_24, %c0_25] : memref<16x56xf32, #tpu.memory_space<vmem>>, vector<16x56xf32>
    %cst_26 = arith.constant dense<0.000000e+00> : vector<16x64xf32>
    %25 = tpu.matmul %24, %23, %cst_26 {dimension_numbers = #tpu.dot_dimension_numbers<[1], [0], [0], [1], [0, 0, 1, 1], [], []>} : vector<16x56xf32>, vector<56x64xf32>, vector<16x64xf32> -> vector<16x64xf32>
    %c0_27 = arith.constant 0 : index
    %c0_28 = arith.constant 0 : index
    %26 = vector.load %arg8[%c0_27, %c0_28] : memref<16x64xf32, #tpu.memory_space<vmem>>, vector<16x64xf32>
    tpu.vector_store %arg8[%c0_27, %c0_28], %25 {strides = array<i32>} : memref<16x64xf32, #tpu.memory_space<vmem>>, vector<16x64xf32>,
    return
  }
  func.func @transform_0(%arg0: i32) -> (i32, i32) {
    %c0_i32 = arith.constant 0 : i32
    %c0_i32_0 = arith.constant 0 : i32
    %c0_i32_1 = arith.constant 0 : i32
    return %c0_i32, %c0_i32_0 : i32, i32
  }
  func.func @transform_1(%arg0: i32) -> (i32, i32) {
    %c0_i32 = arith.constant 0 : i32
    %c0_i32_0 = arith.constant 0 : i32
    %c0_i32_1 = arith.constant 0 : i32
    return %c0_i32, %c0_i32_0 : i32, i32
  }
  func.func @transform_2(%arg0: i32) -> (i32, i32) {
    %c0_i32 = arith.constant 0 : i32
    %c0_i32_0 = arith.constant 0 : i32
    %c0_i32_1 = arith.constant 0 : i32
    return %c0_i32, %c0_i32_0 : i32, i32
  }
  func.func @transform_3(%arg0: i32) -> (i32, i32) {
    %c0_i32 = arith.constant 0 : i32
    %c0_i32_0 = arith.constant 0 : i32
    %c0_i32_1 = arith.constant 0 : i32
    return %c0_i32, %c0_i32_0 : i32, i32
  }
  func.func @transform_4(%arg0: i32) -> (i32, i32) {
    %c0_i32 = arith.constant 0 : i32
    %c0_i32_0 = arith.constant 0 : i32
    %c0_i32_1 = arith.constant 0 : i32
    return %c0_i32, %c0_i32_0 : i32, i32
  }
  func.func @transform_5(%arg0: i32) -> (i32, i32, i32) {
    %c0_i32 = arith.constant 0 : i32
    %c0_i32_0 = arith.constant 0 : i32
    %c0_i32_1 = arith.constant 0 : i32
    %c0_i32_2 = arith.constant 0 : i32
    return %c0_i32, %c0_i32_0, %c0_i32_1 : i32, i32, i32
  }
  func.func @transform_6(%arg0: i32) -> (i32, i32) {
    %c0_i32 = arith.constant 0 : i32
    %c0_i32_0 = arith.constant 0 : i32
    %c0_i32_1 = arith.constant 0 : i32
    return %c0_i32, %c0_i32_0 : i32, i32
  }
  func.func @transform_7(%arg0: i32) -> (i32, i32) {
    %c0_i32 = arith.constant 0 : i32
    %c0_i32_0 = arith.constant 0 : i32
    %c0_i32_1 = arith.constant 0 : i32
    return %c0_i32, %c0_i32_0 : i32, i32
  }
}

</mosaic_0001>

<bundles_post_ra>
// kernel: fourier_block.1
= control target key start
LH: loop header
LB: loop body
LE: loop exit
PB: predicated region body
PF: predicated region fallthrough
CT: control target
= control target key end

     0   :  { %v1686_v3 = vmov 0.0   ;;  %vm48_vm0 = vcmask 654336   ;;  %vm970_vm1 = vcmask 457728   ;;  %vm1052_vm2 = vcmask 523264   ;;  %s2692_s0 = inlined_call_operand.vmem [shape: f32[80,256], index: 0, kind: input, shape index: {}]   ;;  %s2693_s2 = inlined_call_operand.vmem [shape: f32[256,256], index: 2, kind: input, shape index: {}]   ;;  %s2694_s3 = inlined_call_operand.vmem [shape: f32[256,256], index: 3, kind: input, shape index: {}]   ;;  %s2695_s1 = inlined_call_operand.vmem [shape: f32[16,80], index: 1, kind: input, shape index: {}]   ;;  %s2696_s5 = inlined_call_operand.vmem [shape: f32[4,256,64], index: 5, kind: input, shape index: {}]   ;;  %s2697_s4 = inlined_call_operand.vmem [shape: f32[8,256], index: 4, kind: input, shape index: {}]   ;;  %s2698_s6 = inlined_call_operand.vmem [shape: f32[16,56], index: 6, kind: input, shape index: {}]   ;;  %s2699_s7 = inlined_call_operand.vmem [shape: f32[16,64], index: 7, kind: output, shape index: {}]  }
   0x1   :  { %v29_v0 = vld [vmem:[%s2692_s0 + $0x8] sm:$0xff]  ;;  %v31_v1 = vld [vmem:[%s2692_s0 + $0x18] sm:$0xff]  ;;  %v28_v2 = vld [vmem:[%s2692_s0] sm:$0xff]  ;;  %119 = vmatprep.mubr.f32.mxu0 %v1686_v3 }
   0x2   :  { %v1397_v4 = vpack.c.bf16 %v31_v1, %v29_v0  ;;  %v30_v5 = vld [vmem:[%s2692_s0 + $0x10] sm:$0xff]  ;;  %v33_v6 = vld [vmem:[%s2692_s0 + $0x28] sm:$0xff]  ;;  %v35_v7 = vld [vmem:[%s2692_s0 + $0x38] sm:$0xff] }
   0x3   :  { %v1399_v8 = vpack.c.bf16 %v30_v5, %v28_v2  ;;  %v1401_v9 = vpack.c.bf16 %v35_v7, %v33_v6  ;;  %v32_v10 = vld [vmem:[%s2692_s0 + $0x20] sm:$0xff]  ;;  %v34_v11 = vld [vmem:[%s2692_s0 + $0x30] sm:$0xff]  ;;  %v37_v12 = vld [vmem:[%s2692_s0 + $0x48] sm:$0xff] }
   0x4   :  { %1398 = vmatprep.subr.bf16.mxu0 %v1397_v4  ;;  %v39_v13 = vld [vmem:[%s2692_s0 + $0x58] sm:$0xff]  ;;  %v1403_v14 = vpack.c.bf16 %v34_v11, %v32_v10  ;;  %v36_v16 = vld [vmem:[%s2692_s0 + $0x40] sm:$0xff]  ;;  %v38_v17 = vld [vmem:[%s2692_s0 + $0x50] sm:$0xff] }
   0x5   :  { %1400 = vmatpush1.bf16.msra.mxu0 %v1399_v8  ;;  %v1405_v15 = vpack.c.bf16 %v39_v13, %v37_v12  ;;  %v41_v18 = vld [vmem:[%s2692_s0 + $0x68] sm:$0xff]  ;;  %v43_v19 = vld [vmem:[%s2692_s0 + $0x78] sm:$0xff]  ;;  %v1407_v22 = vpack.c.bf16 %v38_v17, %v36_v16  ;;  %v40_v23 = vld [vmem:[%s2692_s0 + $0x60] sm:$0xff] }
   0x6   :  { %1402 = vmatprep.subr.bf16.mxu0 %v1401_v9  ;;  %v133_v20 = vld [vmem:[%s2693_s2 + $0x8] sm:$0xff]  ;;  %v135_v21 = vld [vmem:[%s2693_s2 + $0x18] sm:$0xff]  ;;  %v132_v25 = vld [vmem:[%s2693_s2] sm:$0xff]  ;;  %v1409_v26 = vpack.c.bf16 %v43_v19, %v41_v18 }
   0x7   :  { %v1417_v24 = vpack.c.bf16 %v135_v21, %v133_v20  ;;  %v42_v27 = vld [vmem:[%s2692_s0 + $0x70] sm:$0xff]  ;;  %v45_v28 = vld [vmem:[%s2692_s0 + $0x88] sm:$0xff]  ;;  %v47_v30 = vld [vmem:[%s2692_s0 + $0x98] sm:$0xff] }
   0x8   :  { %v134_v29 = vld [vmem:[%s2693_s2 + $0x10] sm:$0xff]  ;;  %v137_v32 = vld [vmem:[%s2693_s2 + $0x28] sm:$0xff]  ;;  %v139_v33 = vld [vmem:[%s2693_s2 + $0x38] sm:$0xff]  ;;  %v1411_v37 = vpack.c.bf16 %v42_v27, %v40_v23  ;;  %v1413_v41 = vpack.c.bf16 %v47_v30, %v45_v28 }
   0x9   :  { %1404 = vmatpush1.bf16.msra.mxu0 %v1403_v14  ;;  %1418 = vmatprep.subr.bf16.mxu1 %v1417_v24  ;;  %v1419_v31 = vpack.c.bf16 %v134_v29, %v132_v25  ;;  %v1421_v34 = vpack.c.bf16 %v139_v33, %v137_v32  ;;  %v136_v35 = vld [vmem:[%s2693_s2 + $0x20] sm:$0xff]  ;;  %v138_v36 = vld [vmem:[%s2693_s2 + $0x30] sm:$0xff]  ;;  %v141_v40 = vld [vmem:[%s2693_s2 + $0x48] sm:$0xff] }
   0xa   :  { %1406 = vmatprep.subr.bf16.mxu0 %v1405_v15  ;;  %v44_v38 = vld [vmem:[%s2692_s0 + $0x80] sm:$0xff]  ;;  %v1423_v39 = vpack.c.bf16 %v138_v36, %v136_v35  ;;  %v46_v42 = vld [vmem:[%s2692_s0 + $0x90] sm:$0xff]  ;;  %v274_v43 = vld [vmem:[%s2694_s3 + $0x8] sm:$0xff] }
   0xb   :  { %1420 = vmatpush1.bf16.msra.mxu1 %v1419_v31  ;;  %v143_v44 = vld [vmem:[%s2693_s2 + $0x58] sm:$0xff]  ;;  %v140_v47 = vld [vmem:[%s2693_s2 + $0x40] sm:$0xff]  ;;  %v142_v48 = vld [vmem:[%s2693_s2 + $0x50] sm:$0xff]  ;;  %v1415_v51 = vpack.c.bf16 %v46_v42, %v44_v38 }
   0xc   :  { %1422 = vmatprep.subr.bf16.mxu1 %v1421_v34  ;;  %v276_v45 = vld [vmem:[%s2694_s3 + $0x18] sm:$0xff]  ;;  %v1425_v46 = vpack.c.bf16 %v143_v44, %v141_v40  ;;  %v145_v49 = vld [vmem:[%s2693_s2 + $0x68] sm:$0xff]  ;;  %v1427_v52 = vpack.c.bf16 %v142_v48, %v140_v47  ;;  %v273_v54 = vld [vmem:[%s2694_s3] sm:$0xff] }
   0xd   :  { %1408 = vmatpush1.bf16.msra.mxu0 %v1407_v22  ;;  %v147_v50 = vld [vmem:[%s2693_s2 + $0x78] sm:$0xff]  ;;  %v1481_v53 = vpack.c.bf16 %v276_v45, %v274_v43  ;;  %v275_v55 = vld [vmem:[%s2694_s3 + $0x10] sm:$0xff]  ;;  %v278_v56 = vld [vmem:[%s2694_s3 + $0x28] sm:$0xff] }
   0xe   :  { %1410 = vmatprep.subr.bf16.mxu0 %v1409_v26  ;;  %v1429_v57 = vpack.c.bf16 %v147_v50, %v145_v49  ;;  %v280_v58 = vld [vmem:[%s2694_s3 + $0x38] sm:$0xff]  ;;  %v144_v59 = vld [vmem:[%s2693_s2 + $0x60] sm:$0xff]  ;;  %v146_v60 = vld [vmem:[%s2693_s2 + $0x70] sm:$0xff]  ;;  %v1483_v0 = vpack.c.bf16 %v275_v55, %v273_v54 }
   0xf   :  { %1424 = vmatpush1.bf16.msra.mxu1 %v1423_v39  ;;  %v149_v61 = vld [vmem:[%s2693_s2 + $0x88] sm:$0xff]  ;;  %v151_v62 = vld [vmem:[%s2693_s2 + $0x98] sm:$0xff]  ;;  %v26_v63 = vld [vmem:[%s2695_s1] sm:$0xff]  ;;  %v1485_v1 = vpack.c.bf16 %v280_v58, %v278_v56  ;;  %v1431_v6 = vpack.c.bf16 %v146_v60, %v144_v59 }
  0x10   :  { %1426 = vmatprep.subr.bf16.mxu1 %v1425_v46  ;;  %v277_v2 = vld [vmem:[%s2694_s3 + $0x20] sm:$0xff]  ;;  %v279_v4 = vld [vmem:[%s2694_s3 + $0x30] sm:$0xff]  ;;  %v282_v5 = vld [vmem:[%s2694_s3 + $0x48] sm:$0xff]  ;;  %v1433_v8 = vpack.c.bf16 %v151_v62, %v149_v61 }
  0x11   :  { %1412 = vmatpush1.bf16.msra.mxu0 %v1411_v37  ;;  %v284_v7 = vld [vmem:[%s2694_s3 + $0x58] sm:$0xff]  ;;  %v148_v9 = vld [vmem:[%s2693_s2 + $0x80] sm:$0xff]  ;;  %v150_v10 = vld [vmem:[%s2693_s2 + $0x90] sm:$0xff]  ;;  %v1487_v14 = vpack.c.bf16 %v279_v4, %v277_v2 }
  0x12   :  { %1414 = vmatprep.subr.bf16.mxu0 %v1413_v41  ;;  %v153_v11 = vld [vmem:[%s2693_s2 + $0xa8] sm:$0xff]  ;;  %v155_v12 = vld [vmem:[%s2693_s2 + $0xb8] sm:$0xff]  ;;  %v1489_v15 = vpack.c.bf16 %v284_v7, %v282_v5  ;;  %v281_v16 = vld [vmem:[%s2694_s3 + $0x40] sm:$0xff]  ;;  %v1435_v18 = vpack.c.bf16 %v150_v10, %v148_v9 }
  0x13   :  { %1428 = vmatpush1.bf16.msra.mxu1 %v1427_v52  ;;  %v27_v13 = vld [vmem:[%s2695_s1 + $0x8] sm:$0xff]  ;;  %v283_v17 = vld [vmem:[%s2694_s3 + $0x50] sm:$0xff]  ;;  %v288_v19 = vld [vmem:[%s2694_s3 + $0x78] sm:$0xff]  ;;  %v1437_v20 = vpack.c.bf16 %v155_v12, %v153_v11 }
  0x14   :  { %1430 = vmatprep.subr.bf16.mxu1 %v1429_v57  ;;  %v152_v21 = vld [vmem:[%s2693_s2 + $0xa0] sm:$0xff]  ;;  %v154_v22 = vld [vmem:[%s2693_s2 + $0xb0] sm:$0xff]  ;;  %v157_v23 = vld [vmem:[%s2693_s2 + $0xc8] sm:$0xff]  ;;  %v1491_v25 = vpack.c.bf16 %v283_v17, %v281_v16 }
  0x15   :  { %1416 = vmatpush1.bf16.msra.mxu0 %v1415_v51  ;;  %v159_v24 = vld [vmem:[%s2693_s2 + $0xd8] sm:$0xff]  ;;  %v285_v27 = vld [vmem:[%s2694_s3 + $0x60] sm:$0xff]  ;;  %v287_v28 = vld [vmem:[%s2694_s3 + $0x70] sm:$0xff]  ;;  %v1439_v30 = vpack.c.bf16 %v154_v22, %v152_v21 }
  0x16   :  { %1482 = vmatprep.subr.bf16.mxu0 %v1481_v53  ;;  %v290_v29 = vld [vmem:[%s2694_s3 + $0x88] sm:$0xff]  ;;  %v292_v31 = vld [vmem:[%s2694_s3 + $0x98] sm:$0xff]  ;;  %v1441_v32 = vpack.c.bf16 %v159_v24, %v157_v23  ;;  %v156_v33 = vld [vmem:[%s2693_s2 + $0xc0] sm:$0xff]  ;;  %v1495_v37 = vpack.c.bf16 %v287_v28, %v285_v27 }
  0x17   :  { %1432 = vmatpush1.bf16.msra.mxu1 %v1431_v6  ;;  %v158_v34 = vld [vmem:[%s2693_s2 + $0xd0] sm:$0xff]  ;;  %v161_v35 = vld [vmem:[%s2693_s2 + $0xe8] sm:$0xff]  ;;  %v163_v36 = vld [vmem:[%s2693_s2 + $0xf8] sm:$0xff]  ;;  %v1497_v38 = vpack.c.bf16 %v292_v31, %v290_v29 }
  0x18   :  { %1059 = vmatmul.mubr.msk.f32.vlgmr.msra.gmra.mrb[0].mxu0 %vm48_vm0, %v26_v63  ;;  %1434 = vmatprep.subr.bf16.mxu1 %v1433_v8  ;;  %v289_v39 = vld [vmem:[%s2694_s3 + $0x80] sm:$0xff]  ;;  %v291_v40 = vld [vmem:[%s2694_s3 + $0x90] sm:$0xff]  ;;  %v294_v41 = vld [vmem:[%s2694_s3 + $0xa8] sm:$0xff]  ;;  %v1443_v42 = vpack.c.bf16 %v158_v34, %v156_v33  ;;  %v1445_v44 = vpack.c.bf16 %v163_v36, %v161_v35 }
  0x19   :  { %125 = vmatprep.mubr.f32.mxu0 %v1686_v3  ;;  %1484 = vmatpush1.bf16.msra.mxu0 %v1483_v0  ;;  %v286_v3 = vld [vmem:[%s2694_s3 + $0x68] sm:$0xff]  ;;  %v296_v43 = vld [vmem:[%s2694_s3 + $0xb8] sm:$0xff]  ;;  %v160_v45 = vld [vmem:[%s2693_s2 + $0xe0] sm:$0xff]  ;;  %v1499_v49 = vpack.c.bf16 %v291_v40, %v289_v39 }
  0x1a   :  { %1486 = vmatprep.subr.bf16.mxu0 %v1485_v1  ;;  %v1493_v26 = vpack.c.bf16 %v288_v19, %v286_v3  ;;  %v162_v46 = vld [vmem:[%s2693_s2 + $0xf0] sm:$0xff]  ;;  %v165_v47 = vld [vmem:[%s2693_s2 + $0x108] sm:$0xff]  ;;  %v167_v48 = vld [vmem:[%s2693_s2 + $0x118] sm:$0xff]  ;;  %v1501_v50 = vpack.c.bf16 %v296_v43, %v294_v41 }
  0x1b   :  { %1436 = vmatpush1.bf16.msra.mxu1 %v1435_v18  ;;  %v293_v51 = vld [vmem:[%s2694_s3 + $0xa0] sm:$0xff]  ;;  %v295_v52 = vld [vmem:[%s2694_s3 + $0xb0] sm:$0xff]  ;;  %v298_v53 = vld [vmem:[%s2694_s3 + $0xc8] sm:$0xff]  ;;  %v1447_v54 = vpack.c.bf16 %v162_v46, %v160_v45  ;;  %v1449_v56 = vpack.c.bf16 %v167_v48, %v165_v47 }
  0x1c   :  { %1060 = vmatmul.mubr.msk.f32.gmra.mrb[2].mxu0 %vm48_vm0, %v27_v13  ;;  %1438 = vmatprep.subr.bf16.mxu1 %v1437_v20  ;;  %v300_v55 = vld [vmem:[%s2694_s3 + $0xd8] sm:$0xff]  ;;  %v164_v57 = vld [vmem:[%s2693_s2 + $0x100] sm:$0xff]  ;;  %v166_v58 = vld [vmem:[%s2693_s2 + $0x110] sm:$0xff]  ;;  %v1503_v61 = vpack.c.bf16 %v295_v52, %v293_v51 }
  0x1d   :  { %1488 = vmatpush1.bf16.msra.mxu0 %v1487_v14  ;;  %v169_v59 = vld [vmem:[%s2693_s2 + $0x128] sm:$0xff]  ;;  %v171_v60 = vld [vmem:[%s2693_s2 + $0x138] sm:$0xff]  ;;  %v1505_v62 = vpack.c.bf16 %v300_v55, %v298_v53  ;;  %v297_v63 = vld [vmem:[%s2694_s3 + $0xc0] sm:$0xff]  ;;  %v1451_v2 = vpack.c.bf16 %v166_v58, %v164_v57 }
  0x1e   :  { %1490 = vmatprep.subr.bf16.mxu0 %v1489_v15  ;;  %v299_v0 = vld [vmem:[%s2694_s3 + $0xd0] sm:$0xff]  ;;  %v302_v1 = vld [vmem:[%s2694_s3 + $0xe8] sm:$0xff]  ;;  %v304_v4 = vld [vmem:[%s2694_s3 + $0xf8] sm:$0xff]  ;;  %v1453_v5 = vpack.c.bf16 %v171_v60, %v169_v59 }
  0x1f   :  { %1440 = vmatpush1.bf16.msra.mxu1 %v1439_v30  ;;  %v168_v6 = vld [vmem:[%s2693_s2 + $0x120] sm:$0xff]  ;;  %v170_v7 = vld [vmem:[%s2693_s2 + $0x130] sm:$0xff]  ;;  %v173_v8 = vld [vmem:[%s2693_s2 + $0x148] sm:$0xff]  ;;  %v1507_v10 = vpack.c.bf16 %v299_v0, %v297_v63  ;;  %v1509_v11 = vpack.c.bf16 %v304_v4, %v302_v1 }
  0x20   :  { %1442 = vmatprep.subr.bf16.mxu1 %v1441_v32  ;;  %v175_v9 = vld [vmem:[%s2693_s2 + $0x158] sm:$0xff]  ;;  %v301_v12 = vld [vmem:[%s2694_s3 + $0xe0] sm:$0xff]  ;;  %v303_v13 = vld [vmem:[%s2694_s3 + $0xf0] sm:$0xff]  ;;  %v1455_v15 = vpack.c.bf16 %v170_v7, %v168_v6 }
  0x21   :  { %1492 = vmatpush1.bf16.msra.mxu0 %v1491_v25  ;;  %v306_v14 = vld [vmem:[%s2694_s3 + $0x108] sm:$0xff]  ;;  %v308_v16 = vld [vmem:[%s2694_s3 + $0x118] sm:$0xff]  ;;  %v1457_v17 = vpack.c.bf16 %v175_v9, %v173_v8  ;;  %v172_v3 = vld [vmem:[%s2693_s2 + $0x140] sm:$0xff]  ;;  %v1511_v21 = vpack.c.bf16 %v303_v13, %v301_v12 }
  0x22   :  { %1494 = vmatprep.subr.bf16.mxu0 %v1493_v26  ;;  %v174_v18 = vld [vmem:[%s2693_s2 + $0x150] sm:$0xff]  ;;  %v177_v19 = vld [vmem:[%s2693_s2 + $0x168] sm:$0xff]  ;;  %v179_v20 = vld [vmem:[%s2693_s2 + $0x178] sm:$0xff]  ;;  %v1513_v22 = vpack.c.bf16 %v308_v16, %v306_v14 }
  0x23   :  { %1444 = vmatpush1.bf16.msra.mxu1 %v1443_v42  ;;  %v305_v23 = vld [vmem:[%s2694_s3 + $0x100] sm:$0xff]  ;;  %v307_v24 = vld [vmem:[%s2694_s3 + $0x110] sm:$0xff]  ;;  %v310_v25 = vld [vmem:[%s2694_s3 + $0x128] sm:$0xff]  ;;  %v1459_v26 = vpack.c.bf16 %v174_v18, %v172_v3  ;;  %v1461_v28 = vpack.c.bf16 %v179_v20, %v177_v19 }
  0x24   :  { %1446 = vmatprep.subr.bf16.mxu1 %v1445_v44  ;;  %v312_v27 = vld [vmem:[%s2694_s3 + $0x138] sm:$0xff]  ;;  %v176_v29 = vld [vmem:[%s2693_s2 + $0x160] sm:$0xff]  ;;  %v178_v30 = vld [vmem:[%s2693_s2 + $0x170] sm:$0xff]  ;;  %v1515_v33 = vpack.c.bf16 %v307_v24, %v305_v23 }
  0x25   :  { %1496 = vmatpush1.bf16.msra.mxu0 %v1495_v37  ;;  %v181_v31 = vld [vmem:[%s2693_s2 + $0x188] sm:$0xff]  ;;  %v183_v32 = vld [vmem:[%s2693_s2 + $0x198] sm:$0xff]  ;;  %v1517_v34 = vpack.c.bf16 %v312_v27, %v310_v25  ;;  %v309_v35 = vld [vmem:[%s2694_s3 + $0x120] sm:$0xff] }
  0x26   :  { %1498 = vmatprep.subr.bf16.mxu0 %v1497_v38  ;;  %v311_v36 = vld [vmem:[%s2694_s3 + $0x130] sm:$0xff]  ;;  %v314_v37 = vld [vmem:[%s2694_s3 + $0x148] sm:$0xff]  ;;  %v1463_v38 = vpack.c.bf16 %v178_v30, %v176_v29  ;;  %v316_v39 = vld [vmem:[%s2694_s3 + $0x158] sm:$0xff]  ;;  %v1465_v40 = vpack.c.bf16 %v183_v32, %v181_v31 }
  0x27   :  { %1448 = vmatpush1.bf16.msra.mxu1 %v1447_v54  ;;  %v180_v41 = vld [vmem:[%s2693_s2 + $0x180] sm:$0xff]  ;;  %v182_v42 = vld [vmem:[%s2693_s2 + $0x190] sm:$0xff]  ;;  %v185_v43 = vld [vmem:[%s2693_s2 + $0x1a8] sm:$0xff]  ;;  %v1519_v45 = vpack.c.bf16 %v311_v36, %v309_v35  ;;  %v1521_v46 = vpack.c.bf16 %v316_v39, %v314_v37 }
  0x28   :  { %1450 = vmatprep.subr.bf16.mxu1 %v1449_v56  ;;  %v187_v44 = vld [vmem:[%s2693_s2 + $0x1b8] sm:$0xff]  ;;  %v313_v47 = vld [vmem:[%s2694_s3 + $0x140] sm:$0xff]  ;;  %v315_v48 = vld [vmem:[%s2694_s3 + $0x150] sm:$0xff] }
  0x29   :  { %1500 = vmatpush1.bf16.msra.mxu0 %v1499_v49  ;;  %v318_v49 = vld [vmem:[%s2694_s3 + $0x168] sm:$0xff]  ;;  %v320_v51 = vld [vmem:[%s2694_s3 + $0x178] sm:$0xff]  ;;  %v1469_v52 = vpack.c.bf16 %v187_v44, %v185_v43  ;;  %v184_v53 = vld [vmem:[%s2693_s2 + $0x1a0] sm:$0xff]  ;;  %v1523_v57 = vpack.c.bf16 %v315_v48, %v313_v47 }
  0x2a   :  { %1502 = vmatprep.subr.bf16.mxu0 %v1501_v50  ;;  %v1467_v50 = vpack.c.bf16 %v182_v42, %v180_v41  ;;  %v186_v54 = vld [vmem:[%s2693_s2 + $0x1b0] sm:$0xff]  ;;  %v189_v55 = vld [vmem:[%s2693_s2 + $0x1c8] sm:$0xff]  ;;  %v191_v56 = vld [vmem:[%s2693_s2 + $0x1d8] sm:$0xff]  ;;  %v1525_v58 = vpack.c.bf16 %v320_v51, %v318_v49 }
  0x2b   :  { %1452 = vmatpush1.bf16.msra.mxu1 %v1451_v2  ;;  %v317_v59 = vld [vmem:[%s2694_s3 + $0x160] sm:$0xff]  ;;  %v319_v60 = vld [vmem:[%s2694_s3 + $0x170] sm:$0xff]  ;;  %v324_v63 = vld [vmem:[%s2694_s3 + $0x198] sm:$0xff]  ;;  %v1473_v0 = vpack.c.bf16 %v191_v56, %v189_v55 }
  0x2c   :  { %1454 = vmatprep.subr.bf16.mxu1 %v1453_v5  ;;  %v188_v1 = vld [vmem:[%s2693_s2 + $0x1c0] sm:$0xff]  ;;  %v190_v2 = vld [vmem:[%s2693_s2 + $0x1d0] sm:$0xff]  ;;  %v193_v4 = vld [vmem:[%s2693_s2 + $0x1e8] sm:$0xff]  ;;  %v1527_v6 = vpack.c.bf16 %v319_v60, %v317_v59 }
  0x2d   :  { %1504 = vmatpush1.bf16.msra.mxu0 %v1503_v61  ;;  %v322_v61 = vld [vmem:[%s2694_s3 + $0x188] sm:$0xff]  ;;  %v195_v5 = vld [vmem:[%s2693_s2 + $0x1f8] sm:$0xff]  ;;  %v321_v8 = vld [vmem:[%s2694_s3 + $0x180] sm:$0xff] }
  0x2e   :  { %1506 = vmatprep.subr.bf16.mxu0 %v1505_v62  ;;  %v1471_v62 = vpack.c.bf16 %v186_v54, %v184_v53  ;;  %v1529_v7 = vpack.c.bf16 %v324_v63, %v322_v61  ;;  %v323_v9 = vld [vmem:[%s2694_s3 + $0x190] sm:$0xff]  ;;  %v328_v12 = vld [vmem:[%s2694_s3 + $0x1b8] sm:$0xff]  ;;  %v1477_v13 = vpack.c.bf16 %v195_v5, %v193_v4  ;;  %v325_v16 = vld [vmem:[%s2694_s3 + $0x1a0] sm:$0xff] }
  0x2f   :  { %1456 = vmatpush1.bf16.msra.mxu1 %v1455_v15  ;;  %v1531_v14 = vpack.c.bf16 %v323_v9, %v321_v8  ;;  %v330_v3 = vld [vmem:[%s2694_s3 + $0x1c8] sm:$0xff]  ;;  %v332_v18 = vld [vmem:[%s2694_s3 + $0x1d8] sm:$0xff]  ;;  %v192_v27 = vld [vmem:[%s2693_s2 + $0x1e0] sm:$0xff] }
  0x30   :  { %1458 = vmatprep.subr.bf16.mxu1 %v1457_v17  ;;  %v327_v17 = vld [vmem:[%s2694_s3 + $0x1b0] sm:$0xff]  ;;  %v1537_v20 = vpack.c.bf16 %v332_v18, %v330_v3  ;;  %v334_v23 = vld [vmem:[%s2694_s3 + $0x1e8] sm:$0xff]  ;;  %v336_v24 = vld [vmem:[%s2694_s3 + $0x1f8] sm:$0xff] }
  0x31   :  { %1508 = vmatpush1.bf16.msra.mxu0 %v1507_v10  ;;  %v1475_v10 = vpack.c.bf16 %v190_v2, %v188_v1  ;;  %v1535_v19 = vpack.c.bf16 %v327_v17, %v325_v16  ;;  %v333_v29 = vld [vmem:[%s2694_s3 + $0x1e0] sm:$0xff]  ;;  %v335_v31 = vld [vmem:[%s2694_s3 + $0x1f0] sm:$0xff]  ;;  %v1078_v37 = vld [vmem:[%s2696_s5 + $0x188] sm:$0xff] }
  0x32   :  { %1510 = vmatprep.subr.bf16.mxu0 %v1509_v11  ;;  %v326_v11 = vld [vmem:[%s2694_s3 + $0x1a8] sm:$0xff]  ;;  %v1543_v32 = vpack.c.bf16 %v335_v31, %v333_v29  ;;  %v1077_v35 = vld [vmem:[%s2696_s5 + $0x180] sm:$0xff]  ;;  %v434_v43 = vld [vmem:[%s2696_s5 + $0x90] sm:$0xff] }
  0x33   :  { %1460 = vmatpush1.bf16.msra.mxu1 %v1459_v26  ;;  %v1533_v15 = vpack.c.bf16 %v328_v12, %v326_v11  ;;  %v1541_v26 = vpack.c.bf16 %v336_v24, %v334_v23  ;;  %v416_v39 = vld [vmem:[%s2696_s5] sm:$0xff]  ;;  %v1062_v42 = vld [vmem:[%s2696_s5 + $0x108] sm:$0xff]  ;;  %v435_v44 = vld [vmem:[%s2696_s5 + $0x98] sm:$0xff] }
  0x34   :  { %1462 = vmatprep.subr.bf16.mxu1 %v1461_v28  ;;  %v194_v28 = vld [vmem:[%s2693_s2 + $0x1f0] sm:$0xff]  ;;  %v1061_v41 = vld [vmem:[%s2696_s5 + $0x100] sm:$0xff]  ;;  %v419_v51 = vld [vmem:[%s2696_s5 + $0x18] sm:$0xff]  ;;  %v1549_v53 = vpack.c.bf16 %v435_v44, %v434_v43 }
  0x35   :  { %1512 = vmatpush1.bf16.msra.mxu0 %v1511_v21  ;;  %v329_v21 = vld [vmem:[%s2694_s3 + $0x1c0] sm:$0xff]  ;;  %v1479_v30 = vpack.c.bf16 %v194_v28, %v192_v27  ;;  %v1579_v49 = vpack.c.bf16 %v1062_v42, %v1061_v41  ;;  %v1063_v55 = vld [vmem:[%s2696_s5 + $0x110] sm:$0xff]  ;;  %v1064_v56 = vld [vmem:[%s2696_s5 + $0x118] sm:$0xff] }
  0x36   :  { %1514 = vmatprep.subr.bf16.mxu0 %v1513_v22  ;;  %v331_v22 = vld [vmem:[%s2694_s3 + $0x1d0] sm:$0xff]  ;;  %v1081_v59 = vld [vmem:[%s2696_s5 + $0x1a0] sm:$0xff]  ;;  %v1082_v60 = vld [vmem:[%s2696_s5 + $0x1a8] sm:$0xff]  ;;  %v1583_v63 = vpack.c.bf16 %v1064_v56, %v1063_v55 }
  0x37   :  { %1464 = vmatpush1.bf16.msra.mxu1 %v1463_v38  ;;  %v1539_v25 = vpack.c.bf16 %v331_v22, %v329_v21  ;;  %v1577_v38 = vpack.c.bf16 %v1078_v37, %v1077_v35  ;;  %v421_v1 = vld [vmem:[%s2696_s5 + $0x28] sm:$0xff]  ;;  %v1585_v5 = vpack.c.bf16 %v1082_v60, %v1081_v59  ;;  %v438_v8 = vld [vmem:[%s2696_s5 + $0xb0] sm:$0xff]  ;;  %v439_v9 = vld [vmem:[%s2696_s5 + $0xb8] sm:$0xff] }
  0x38   :  { %1466 = vmatprep.subr.bf16.mxu1 %v1465_v40  ;;  %v417_v40 = vld [vmem:[%s2696_s5 + $0x8] sm:$0xff]  ;;  %v1084_v11 = vld [vmem:[%s2696_s5 + $0x1b8] sm:$0xff]  ;;  %v1557_v16 = vpack.c.bf16 %v439_v9, %v438_v8  ;;  %v1067_v3 = vld [vmem:[%s2696_s5 + $0x130] sm:$0xff] }
  0x39   :  { %1516 = vmatpush1.bf16.msra.mxu0 %v1515_v33  ;;  %v432_v33 = vld [vmem:[%s2696_s5 + $0x80] sm:$0xff]  ;;  %v1547_v48 = vpack.c.bf16 %v417_v40, %v416_v39  ;;  %v1068_v18 = vld [vmem:[%s2696_s5 + $0x138] sm:$0xff]  ;;  %v1086_v22 = vld [vmem:[%s2696_s5 + $0x1c8] sm:$0xff] }
  0x3a   :  { %1518 = vmatprep.subr.bf16.mxu0 %v1517_v34  ;;  %v433_v34 = vld [vmem:[%s2696_s5 + $0x88] sm:$0xff]  ;;  %v1085_v21 = vld [vmem:[%s2696_s5 + $0x1c0] sm:$0xff]  ;;  %v1591_v24 = vpack.c.bf16 %v1068_v18, %v1067_v3  ;;  %v442_v31 = vld [vmem:[%s2696_s5 + $0xd0] sm:$0xff] }
  0x3b   :  { %1468 = vmatpush1.bf16.msra.mxu1 %v1467_v50  ;;  %v1545_v36 = vpack.c.bf16 %v433_v34, %v432_v33  ;;  %v418_v50 = vld [vmem:[%s2696_s5 + $0x10] sm:$0xff]  ;;  %v1593_v28 = vpack.c.bf16 %v1086_v22, %v1085_v21  ;;  %v1069_v29 = vld [vmem:[%s2696_s5 + $0x140] sm:$0xff]  ;;  %v1088_v34 = vld [vmem:[%s2696_s5 + $0x1d8] sm:$0xff] }
  0x3c   :  { %1470 = vmatprep.subr.bf16.mxu1 %v1469_v52  ;;  %v1087_v33 = vld [vmem:[%s2696_s5 + $0x1d0] sm:$0xff]  ;;  %v1072_v42 = vld [vmem:[%s2696_s5 + $0x158] sm:$0xff]  ;;  %v444_v43 = vld [vmem:[%s2696_s5 + $0xe0] sm:$0xff] }
  0x3d   :  { %1520 = vmatpush1.bf16.msra.mxu0 %v1519_v45  ;;  %v1079_v45 = vld [vmem:[%s2696_s5 + $0x190] sm:$0xff]  ;;  %v1597_v40 = vpack.c.bf16 %v1088_v34, %v1087_v33  ;;  %v445_v44 = vld [vmem:[%s2696_s5 + $0xe8] sm:$0xff]  ;;  %v1073_v55 = vld [vmem:[%s2696_s5 + $0x160] sm:$0xff] }
  0x3e   :  { %1522 = vmatprep.subr.bf16.mxu0 %v1521_v46  ;;  %v1080_v46 = vld [vmem:[%s2696_s5 + $0x198] sm:$0xff]  ;;  %v426_v37 = vld [vmem:[%s2696_s5 + $0x50] sm:$0xff]  ;;  %v1074_v56 = vld [vmem:[%s2696_s5 + $0x168] sm:$0xff] }
  0x3f   :  { %1472 = vmatpush1.bf16.msra.mxu1 %v1471_v62  ;;  %v1581_v54 = vpack.c.bf16 %v1080_v46, %v1079_v45  ;;  %v1551_v62 = vpack.c.bf16 %v419_v51, %v418_v50  ;;  %v1071_v41 = vld [vmem:[%s2696_s5 + $0x150] sm:$0xff]  ;;  %v1089_v45 = vld [vmem:[%s2696_s5 + $0x1e0] sm:$0xff]  ;;  %v1090_v46 = vld [vmem:[%s2696_s5 + $0x1e8] sm:$0xff] }
  0x40   :  { %1474 = vmatprep.subr.bf16.mxu1 %v1473_v0  ;;  %v420_v0 = vld [vmem:[%s2696_s5 + $0x20] sm:$0xff]  ;;  %v429_v51 = vld [vmem:[%s2696_s5 + $0x68] sm:$0xff]  ;;  %v1091_v59 = vld [vmem:[%s2696_s5 + $0x1f0] sm:$0xff] }
  0x41   :  { %1524 = vmatpush1.bf16.msra.mxu0 %v1523_v57  ;;  %v436_v57 = vld [vmem:[%s2696_s5 + $0xa0] sm:$0xff]  ;;  %v1555_v12 = vpack.c.bf16 %v421_v1, %v420_v0  ;;  %v1092_v60 = vld [vmem:[%s2696_s5 + $0x1f8] sm:$0xff]  ;;  %v430_v0 = vld [vmem:[%s2696_s5 + $0x70] sm:$0xff] }
  0x42   :  { %1526 = vmatprep.subr.bf16.mxu0 %v1525_v58  ;;  %v437_v58 = vld [vmem:[%s2696_s5 + $0xa8] sm:$0xff]  ;;  %v428_v50 = vld [vmem:[%s2696_s5 + $0x60] sm:$0xff]  ;;  %v1143_v21 = vld [vmem:[%s2696_s5 + $0x390] sm:$0xff] }
  0x43   :  { %1476 = vmatpush1.bf16.msra.mxu1 %v1475_v10  ;;  %v1553_v4 = vpack.c.bf16 %v437_v58, %v436_v57  ;;  %v1083_v10 = vld [vmem:[%s2696_s5 + $0x1b0] sm:$0xff]  ;;  %v447_v58 = vld [vmem:[%s2696_s5 + $0xf8] sm:$0xff]  ;;  %v1125_v3 = vld [vmem:[%s2696_s5 + $0x300] sm:$0xff] }
  0x44   :  { %1478 = vmatprep.subr.bf16.mxu1 %v1477_v13  ;;  %v1589_v17 = vpack.c.bf16 %v1084_v11, %v1083_v10  ;;  %v446_v57 = vld [vmem:[%s2696_s5 + $0xf0] sm:$0xff]  ;;  %v1109_v10 = vld [vmem:[%s2696_s5 + $0x280] sm:$0xff]  ;;  %v1110_v11 = vld [vmem:[%s2696_s5 + $0x288] sm:$0xff] }
  0x45   :  { %1528 = vmatpush1.bf16.msra.mxu0 %v1527_v6  ;;  %v1065_v6 = vld [vmem:[%s2696_s5 + $0x120] sm:$0xff]  ;;  %v1573_v1 = vpack.c.bf16 %v447_v58, %v446_v57  ;;  %v1126_v18 = vld [vmem:[%s2696_s5 + $0x308] sm:$0xff]  ;;  %v1144_v22 = vld [vmem:[%s2696_s5 + $0x398] sm:$0xff] }
  0x46   :  { %1530 = vmatprep.subr.bf16.mxu0 %v1529_v7  ;;  %v1066_v7 = vld [vmem:[%s2696_s5 + $0x128] sm:$0xff]  ;;  %v1127_v33 = vld [vmem:[%s2696_s5 + $0x310] sm:$0xff]  ;;  %v1128_v34 = vld [vmem:[%s2696_s5 + $0x318] sm:$0xff] }
  0x47   :  { %1480 = vmatpush1.bf16.msra.mxu1 %v1479_v30  ;;  %v1587_v13 = vpack.c.bf16 %v1066_v7, %v1065_v6  ;;  %v1070_v30 = vld [vmem:[%s2696_s5 + $0x148] sm:$0xff]  ;;  %v1075_v6 = vld [vmem:[%s2696_s5 + $0x170] sm:$0xff]  ;;  %v1076_v7 = vld [vmem:[%s2696_s5 + $0x178] sm:$0xff] }
  0x48   :  { %1546 = vmatprep.subr.bf16.mxu1 %v1545_v36  ;;  %v1595_v36 = vpack.c.bf16 %v1070_v30, %v1069_v29  ;;  %v1607_v9 = vpack.c.bf16 %v1076_v7, %v1075_v6  ;;  %v1149_v6 = vld [vmem:[%s2696_s5 + $0x3c0] sm:$0xff]  ;;  %v1150_v7 = vld [vmem:[%s2696_s5 + $0x3c8] sm:$0xff] }
  0x49   :  { %1532 = vmatpush1.bf16.msra.mxu0 %v1531_v14  ;;  %v422_v14 = vld [vmem:[%s2696_s5 + $0x30] sm:$0xff] }
  0x4a   :  { %1534 = vmatprep.subr.bf16.mxu0 %v1533_v15  ;;  %v423_v15 = vld [vmem:[%s2696_s5 + $0x38] sm:$0xff] }
  0x4b   :  { %v1559_v23 = vpack.c.bf16 %v423_v15, %v422_v14  ;;  %v1142_v14 = vld [vmem:[%s2696_s5 + $0x388] sm:$0xff] }
  0x4d   :  { %1536 = vmatpush1.bf16.msra.mxu0 %v1535_v19  ;;  %v440_v19 = vld [vmem:[%s2696_s5 + $0xc0] sm:$0xff] }
  0x4e   :  { %1538 = vmatprep.subr.bf16.mxu0 %v1537_v20  ;;  %v441_v20 = vld [vmem:[%s2696_s5 + $0xc8] sm:$0xff] }
  0x4f   :  { %v1561_v27 = vpack.c.bf16 %v441_v20, %v440_v19  ;;  %v1111_v19 = vld [vmem:[%s2696_s5 + $0x290] sm:$0xff]  ;;  %v1112_v20 = vld [vmem:[%s2696_s5 + $0x298] sm:$0xff] }
  0x50   :  { %v1613_v30 = vpack.c.bf16 %v1112_v20, %v1111_v19 }
  0x51   :  { %1540 = vmatpush1.bf16.msra.mxu0 %v1539_v25  ;;  %v424_v25 = vld [vmem:[%s2696_s5 + $0x40] sm:$0xff] }
  0x52   :  { %1542 = vmatprep.subr.bf16.mxu0 %v1541_v26  ;;  %v425_v26 = vld [vmem:[%s2696_s5 + $0x48] sm:$0xff] }
  0x53   :  { %v1563_v35 = vpack.c.bf16 %v425_v26, %v424_v25  ;;  %v1643_v26 = vpack.c.bf16 %v1126_v18, %v1125_v3  ;;  %v1151_v3 = vld [vmem:[%s2696_s5 + $0x3d0] sm:$0xff]  ;;  %v1152_v18 = vld [vmem:[%s2696_s5 + $0x3d8] sm:$0xff] }
  0x55   :  { %1544 = vmatpush1.bf16.msra.mxu0 %v1543_v32  ;;  %v443_v32 = vld [vmem:[%s2696_s5 + $0xd8] sm:$0xff] }
  0x56   :  { %1578 = vmatprep.subr.bf16.mxu0 %v1577_v38  ;;  %v427_v38 = vld [vmem:[%s2696_s5 + $0x58] sm:$0xff]  ;;  %v1565_v39 = vpack.c.bf16 %v443_v32, %v442_v31  ;;  %v1645_v31 = vpack.c.bf16 %v1144_v22, %v1143_v21  ;;  %v1103_v21 = vld [vmem:[%s2696_s5 + $0x250] sm:$0xff] }
  0x57   :  { %v1096_v32 = vld [vmem:[%s2696_s5 + $0x218] sm:$0xff] }
  0x58   :  { %v1104_v22 = vld [vmem:[%s2696_s5 + $0x258] sm:$0xff] }
  0xeb   :  { %v2217_v47 = vpop.f32.mrb[0].mxu0 }
  0xec   :  { %v2225_v52 = vpop.f32.mrb[1].mxu0 }
  0xed   :  { %260 = vmatprep.mubr.f32.mxu1 %v2225_v52  ;;  %401 = vmatprep.mubr.f32.mxu0 %v2225_v52 }
  0xee   :  { %261 = vmatmul.mubr.f32.vlgmr.msra.gmra.mrb[0].mxu1 %v2217_v47  ;;  %402 = vmatmul.mubr.f32.vlgmr.msra.gmra.mrb[4].mxu0 %v2217_v47 }
  0xef   :  { %v2249_v61 = vpop.f32.mrb[2].mxu0  ;;  %1548 = vmatpush3.bf16.msra.mxu1 %v1547_v48  ;;  %1580 = vmatpush3.bf16.msra.mxu0 %v1579_v49  ;;  %v1567_v48 = vpack.c.bf16 %v427_v38, %v426_v37  ;;  %v1599_v49 = vpack.c.bf16 %v1072_v42, %v1071_v41  ;;  %v1145_v37 = vld [vmem:[%s2696_s5 + $0x3a0] sm:$0xff]  ;;  %v1146_v38 = vld [vmem:[%s2696_s5 + $0x3a8] sm:$0xff]  ;;  %v1647_v42 = vpack.c.bf16 %v1128_v34, %v1127_v33 }
  0xf0   :  { %v2257_v2 = vpop.f32.mrb[3].mxu0  ;;  %1550 = vmatprep.subr.bf16.mxu1 %v1549_v53  ;;  %1582 = vmatprep.subr.bf16.mxu0 %v1581_v54  ;;  %v1569_v53 = vpack.c.bf16 %v445_v44, %v444_v43  ;;  %v1601_v54 = vpack.c.bf16 %v1090_v46, %v1089_v45  ;;  %v1097_v43 = vld [vmem:[%s2696_s5 + $0x220] sm:$0xff]  ;;  %v1098_v46 = vld [vmem:[%s2696_s5 + $0x228] sm:$0xff] }
  0xf1   :  { %266 = vmatprep.mubr.f32.mxu1 %v2257_v2  ;;  %407 = vmatprep.mubr.f32.mxu0 %v2257_v2  ;;  %v1619_v57 = vpack.c.bf16 %v1098_v46, %v1097_v43  ;;  %v1153_v33 = vld [vmem:[%s2696_s5 + $0x3e0] sm:$0xff]  ;;  %v1154_v34 = vld [vmem:[%s2696_s5 + $0x3e8] sm:$0xff] }
  0xf2   :  { %267 = vmatmul.mubr.f32.gmra.mrb[2].mxu1 %v2249_v61  ;;  %408 = vmatmul.mubr.f32.gmra.mrb[6].mxu0 %v2249_v61  ;;  %v415_v43 = vld [vmem:[%s2697_s4 + $0x8] sm:$0xff] }
  0xf3   :  { %1552 = vmatpush3.bf16.msra.mxu1 %v1551_v62  ;;  %1584 = vmatpush3.bf16.msra.mxu0 %v1583_v63  ;;  %v1571_v62 = vpack.c.bf16 %v429_v51, %v428_v50  ;;  %v1603_v63 = vpack.c.bf16 %v1074_v56, %v1073_v55  ;;  %v1649_v51 = vpack.c.bf16 %v1146_v38, %v1145_v37  ;;  %v1147_v55 = vld [vmem:[%s2696_s5 + $0x3b0] sm:$0xff]  ;;  %v1148_v56 = vld [vmem:[%s2696_s5 + $0x3b8] sm:$0xff]  ;;  %v1105_v37 = vld [vmem:[%s2696_s5 + $0x260] sm:$0xff] }
  0xf4   :  { %1554 = vmatprep.subr.bf16.mxu1 %v1553_v4  ;;  %1586 = vmatprep.subr.bf16.mxu0 %v1585_v5  ;;  %v1605_v4 = vpack.c.bf16 %v1092_v60, %v1091_v59  ;;  %v431_v5 = vld [vmem:[%s2696_s5 + $0x78] sm:$0xff]  ;;  %v1099_v59 = vld [vmem:[%s2696_s5 + $0x230] sm:$0xff]  ;;  %v1106_v38 = vld [vmem:[%s2696_s5 + $0x268] sm:$0xff] }
  0xf5   :  { %v1575_v8 = vpack.c.bf16 %v431_v5, %v430_v0  ;;  %v1100_v60 = vld [vmem:[%s2696_s5 + $0x238] sm:$0xff]  ;;  %v1118_v5 = vld [vmem:[%s2696_s5 + $0x2c8] sm:$0xff] }
  0xf7   :  { %1556 = vmatpush3.bf16.msra.mxu1 %v1555_v12  ;;  %1588 = vmatpush3.bf16.msra.mxu0 %v1587_v13  ;;  %v1141_v12 = vld [vmem:[%s2696_s5 + $0x380] sm:$0xff]  ;;  %v1609_v13 = vpack.c.bf16 %v1110_v11, %v1109_v10  ;;  %v1102_v11 = vld [vmem:[%s2696_s5 + $0x248] sm:$0xff] }
  0xf8   :  { %1558 = vmatprep.subr.bf16.mxu1 %v1557_v16  ;;  %1590 = vmatprep.subr.bf16.mxu0 %v1589_v17  ;;  %v1641_v15 = vpack.c.bf16 %v1142_v14, %v1141_v12  ;;  %v1093_v16 = vld [vmem:[%s2696_s5 + $0x200] sm:$0xff]  ;;  %v1094_v17 = vld [vmem:[%s2696_s5 + $0x208] sm:$0xff] }
  0xf9   :  { %v1611_v25 = vpack.c.bf16 %v1094_v17, %v1093_v16  ;;  %v1101_v10 = vld [vmem:[%s2696_s5 + $0x240] sm:$0xff]  ;;  %v1119_v16 = vld [vmem:[%s2696_s5 + $0x2d0] sm:$0xff]  ;;  %v1120_v17 = vld [vmem:[%s2696_s5 + $0x2d8] sm:$0xff] }
  0xfa   :  { %v1133_v12 = vld [vmem:[%s2696_s5 + $0x340] sm:$0xff]  ;;  %v1627_v19 = vpack.c.bf16 %v1102_v11, %v1101_v10 }
  0xfb   :  { %1560 = vmatpush3.bf16.msra.mxu1 %v1559_v23  ;;  %1592 = vmatpush3.bf16.msra.mxu0 %v1591_v24 }
  0xfc   :  { %1562 = vmatprep.subr.bf16.mxu1 %v1561_v27  ;;  %1594 = vmatprep.subr.bf16.mxu0 %v1593_v28  ;;  %v1095_v27 = vld [vmem:[%s2696_s5 + $0x210] sm:$0xff] }
  0xfd   :  { %v1615_v41 = vpack.c.bf16 %v1096_v32, %v1095_v27  ;;  %v1629_v27 = vpack.c.bf16 %v1120_v17, %v1119_v16  ;;  %v1122_v32 = vld [vmem:[%s2696_s5 + $0x2e8] sm:$0xff] }
  0xff   :  { %1564 = vmatpush3.bf16.msra.mxu1 %v1563_v35  ;;  %1596 = vmatpush3.bf16.msra.mxu0 %v1595_v36  ;;  %v1113_v35 = vld [vmem:[%s2696_s5 + $0x2a0] sm:$0xff]  ;;  %v1114_v36 = vld [vmem:[%s2696_s5 + $0x2a8] sm:$0xff] }
 0x100   :  { %1566 = vmatprep.subr.bf16.mxu1 %v1565_v39  ;;  %1598 = vmatprep.subr.bf16.mxu0 %v1597_v40  ;;  %v1617_v50 = vpack.c.bf16 %v1114_v36, %v1113_v35  ;;  %v1631_v35 = vpack.c.bf16 %v1104_v22, %v1103_v21 }
 0x103   :  { %1568 = vmatpush3.bf16.msra.mxu1 %v1567_v48  ;;  %1600 = vmatpush3.bf16.msra.mxu0 %v1599_v49  ;;  %v1129_v48 = vld [vmem:[%s2696_s5 + $0x320] sm:$0xff]  ;;  %v1130_v49 = vld [vmem:[%s2696_s5 + $0x328] sm:$0xff] }
 0x104   :  { %1570 = vmatprep.subr.bf16.mxu1 %v1569_v53  ;;  %1602 = vmatprep.subr.bf16.mxu0 %v1601_v54  ;;  %v1115_v53 = vld [vmem:[%s2696_s5 + $0x2b0] sm:$0xff]  ;;  %v1116_v54 = vld [vmem:[%s2696_s5 + $0x2b8] sm:$0xff]  ;;  %v1651_v58 = vpack.c.bf16 %v1130_v49, %v1129_v48  ;;  %v1665_v48 = vpack.c.bf16 %v1154_v34, %v1153_v33 }
 0x105   :  { %v1621_v0 = vpack.c.bf16 %v1116_v54, %v1115_v53  ;;  %v1123_v49 = vld [vmem:[%s2696_s5 + $0x2f0] sm:$0xff]  ;;  %v1156_v53 = vld [vmem:[%s2696_s5 + $0x3f8] sm:$0xff]  ;;  %v414_v54 = vld [vmem:[%s2697_s4] sm:$0xff] }
 0x107   :  { %1572 = vmatpush3.bf16.msra.mxu1 %v1571_v62  ;;  %1604 = vmatpush3.bf16.msra.mxu0 %v1603_v63  ;;  %v1131_v62 = vld [vmem:[%s2696_s5 + $0x330] sm:$0xff]  ;;  %v1132_v63 = vld [vmem:[%s2696_s5 + $0x338] sm:$0xff] }
 0x108   :  { %1574 = vmatprep.subr.bf16.mxu1 %v1573_v1  ;;  %1606 = vmatprep.subr.bf16.mxu0 %v1605_v4  ;;  %v1653_v1 = vpack.c.bf16 %v1148_v56, %v1147_v55  ;;  %v1117_v4 = vld [vmem:[%s2696_s5 + $0x2c0] sm:$0xff]  ;;  %v1635_v55 = vpack.c.bf16 %v1106_v38, %v1105_v37 }
 0x109   :  { %v1625_v14 = vpack.c.bf16 %v1118_v5, %v1117_v4 }
 0x10b   :  { %1576 = vmatpush3.bf16.msra.mxu1 %v1575_v8  ;;  %1608 = vmatpush3.bf16.msra.mxu0 %v1607_v9  ;;  %v1623_v8 = vpack.c.bf16 %v1100_v60, %v1099_v59  ;;  %v1655_v9 = vpack.c.bf16 %v1132_v63, %v1131_v62  ;;  %v1139_v59 = vld [vmem:[%s2696_s5 + $0x370] sm:$0xff]  ;;  %v1140_v60 = vld [vmem:[%s2696_s5 + $0x378] sm:$0xff] }
 0x10c   :  { %1610 = vmatprep.subr.bf16.mxu1 %v1609_v13  ;;  %1642 = vmatprep.subr.bf16.mxu0 %v1641_v15  ;;  %v1134_v13 = vld [vmem:[%s2696_s5 + $0x348] sm:$0xff]  ;;  %v1657_v15 = vpack.c.bf16 %v1150_v7, %v1149_v6 }
 0x10d   :  { %v1659_v20 = vpack.c.bf16 %v1134_v13, %v1133_v12 }
 0x1c1   :  { %v2425_v23 = vpop.f32.mrb[0].mxu1  ;;  %v2427_v24 = vpop.f32.mrb[4].mxu0 }
 0x1c2   :  { %v2432_v28 = vpop.f32.mrb[1].mxu1  ;;  %v2434_v29 = vpop.f32.mrb[5].mxu0 }
 0x1c3   :  { %512 = vmatprep.mubr.f32.mxu1 %v2432_v28  ;;  %645 = vmatprep.mubr.f32.mxu0 %v2432_v28 }
 0x1c4   :  { %513 = vmatmul.mubr.f32.vlgmr.msra.gmra.mrb[4].mxu1 %v2425_v23  ;;  %646 = vmatmul.mubr.f32.vlgmr.msra.gmra.mrb[8].mxu0 %v2425_v23 }
 0x1c5   :  { %1612 = vmatpush3.bf16.msra.mxu1 %v1611_v25  ;;  %1644 = vmatpush3.bf16.msra.mxu0 %v1643_v26  ;;  %v2461_v39 = vpop.f32.mrb[2].mxu1  ;;  %v2463_v40 = vpop.f32.mrb[6].mxu0  ;;  %v1135_v25 = vld [vmem:[%s2696_s5 + $0x350] sm:$0xff]  ;;  %v1136_v26 = vld [vmem:[%s2696_s5 + $0x358] sm:$0xff] }
 0x1c6   :  { %v2468_v44 = vpop.f32.mrb[3].mxu1  ;;  %v2470_v45 = vpop.f32.mrb[7].mxu0  ;;  %1614 = vmatprep.subr.bf16.mxu1 %v1613_v30  ;;  %1646 = vmatprep.subr.bf16.mxu0 %v1645_v31  ;;  %v1661_v30 = vpack.c.bf16 %v1152_v18, %v1151_v3  ;;  %v1121_v31 = vld [vmem:[%s2696_s5 + $0x2e0] sm:$0xff]  ;;  %v1663_v36 = vpack.c.bf16 %v1136_v26, %v1135_v25 }
 0x1c7   :  { %517 = vmatprep.mubr.f32.mxu1 %v2468_v44  ;;  %650 = vmatprep.mubr.f32.mxu0 %v2468_v44  ;;  %v1633_v46 = vpack.c.bf16 %v1122_v32, %v1121_v31 }
 0x1c8   :  { %518 = vmatmul.mubr.f32.gmra.mrb[6].mxu1 %v2461_v39  ;;  %651 = vmatmul.mubr.f32.gmra.mrb[10].mxu0 %v2461_v39 }
 0x1c9   :  { %1616 = vmatpush3.bf16.msra.mxu1 %v1615_v41  ;;  %1648 = vmatpush3.bf16.msra.mxu0 %v1647_v42  ;;  %v1137_v41 = vld [vmem:[%s2696_s5 + $0x360] sm:$0xff]  ;;  %v1138_v42 = vld [vmem:[%s2696_s5 + $0x368] sm:$0xff] }
 0x1ca   :  { %522 = vmatprep.mubr.f32.mxu1 %v2434_v29  ;;  %655 = vmatprep.mubr.f32.mxu0 %v2434_v29  ;;  %v1667_v56 = vpack.c.bf16 %v1138_v42, %v1137_v41 }
 0x1cb   :  { %1618 = vmatprep.subr.bf16.mxu1 %v1617_v50  ;;  %1650 = vmatprep.subr.bf16.mxu0 %v1649_v51  ;;  %v1124_v50 = vld [vmem:[%s2696_s5 + $0x2f8] sm:$0xff]  ;;  %v1155_v51 = vld [vmem:[%s2696_s5 + $0x3f0] sm:$0xff] }
 0x1cc   :  { %523 = vmatmul.mubr.f32.gmra.mrb[8].mxu1 %v2427_v24  ;;  %656 = vmatmul.mubr.f32.gmra.mrb[12].mxu0 %v2427_v24  ;;  %v1637_v62 = vpack.c.bf16 %v1124_v50, %v1123_v49  ;;  %v1669_v63 = vpack.c.bf16 %v1156_v53, %v1155_v51 }
 0x1cd   :  { %1620 = vmatpush3.bf16.msra.mxu1 %v1619_v57  ;;  %1652 = vmatpush3.bf16.msra.mxu0 %v1651_v58  ;;  %v1107_v57 = vld [vmem:[%s2696_s5 + $0x270] sm:$0xff]  ;;  %v1108_v58 = vld [vmem:[%s2696_s5 + $0x278] sm:$0xff] }
 0x1ce   :  { %527 = vmatprep.mubr.f32.mxu1 %v2470_v45  ;;  %660 = vmatprep.mubr.f32.mxu0 %v2470_v45 }
 0x1cf   :  { %1622 = vmatprep.subr.bf16.mxu1 %v1621_v0  ;;  %1654 = vmatprep.subr.bf16.mxu0 %v1653_v1  ;;  %v1639_v0 = vpack.c.bf16 %v1108_v58, %v1107_v57  ;;  %v1671_v1 = vpack.c.bf16 %v1140_v60, %v1139_v59 }
 0x1d0   :  { %528 = vmatmul.mubr.f32.gmra.mrb[10].mxu1 %v2463_v40  ;;  %661 = vmatmul.mubr.f32.gmra.mrb[14].mxu0 %v2463_v40 }
 0x1d1   :  { %1624 = vmatpush3.bf16.msra.mxu1 %v1623_v8  ;;  %1656 = vmatpush3.bf16.msra.mxu0 %v1655_v9 }
 0x1d2   :  { %532 = vmatprep.mubr.f32.mxu1 %v2225_v52  ;;  %665 = vmatprep.mubr.f32.mxu0 %v2225_v52 }
 0x1d3   :  { %1626 = vmatprep.subr.bf16.mxu1 %v1625_v14  ;;  %1658 = vmatprep.subr.bf16.mxu0 %v1657_v15 }
 0x1d4   :  { %533 = vmatmul.mubr.f32.gmra.mrb[12].mxu1 %v2217_v47  ;;  %666 = vmatmul.mubr.f32.gmra.mrb[16].mxu0 %v2217_v47 }
 0x1d5   :  { %1628 = vmatpush3.bf16.msra.mxu1 %v1627_v19  ;;  %1660 = vmatpush3.bf16.msra.mxu0 %v1659_v20 }
 0x1d6   :  { %537 = vmatprep.mubr.f32.mxu1 %v2257_v2  ;;  %670 = vmatprep.mubr.f32.mxu0 %v2257_v2 }
 0x1d7   :  { %1630 = vmatprep.subr.bf16.mxu1 %v1629_v27  ;;  %1662 = vmatprep.subr.bf16.mxu0 %v1661_v30 }
 0x1d8   :  { %538 = vmatmul.mubr.f32.gmra.mrb[14].mxu1 %v2249_v61  ;;  %671 = vmatmul.mubr.f32.gmra.mrb[18].mxu0 %v2249_v61 }
 0x1d9   :  { %1632 = vmatpush3.bf16.msra.mxu1 %v1631_v35  ;;  %1664 = vmatpush3.bf16.msra.mxu0 %v1663_v36 }
 0x1da   :  { %542 = vmatprep.mubr.f32.mxu1 %v415_v43  ;;  %675 = vmatprep.mubr.f32.mxu0 %v415_v43 }
 0x1db   :  { %1634 = vmatprep.subr.bf16.mxu1 %v1633_v46  ;;  %1666 = vmatprep.subr.bf16.mxu0 %v1665_v48 }
 0x1dc   :  { %543 = vmatmul.mubr.f32.gmra.mrb[16].mxu1 %v414_v54  ;;  %676 = vmatmul.mubr.f32.gmra.mrb[20].mxu0 %v414_v54 }
 0x1dd   :  { %1636 = vmatpush3.bf16.msra.mxu1 %v1635_v55  ;;  %1668 = vmatpush3.bf16.msra.mxu0 %v1667_v56 }
 0x1de   :  { %778 = vmatprep.mubr.f32.mxu1 %v2432_v28  ;;  %911 = vmatprep.mubr.f32.mxu0 %v2432_v28 }
 0x1df   :  { %1638 = vmatprep.subr.bf16.mxu1 %v1637_v62  ;;  %1670 = vmatprep.subr.bf16.mxu0 %v1669_v63 }
 0x1e1   :  { %1640 = vmatpush3.bf16.msra.mxu1 %v1639_v0  ;;  %1672 = vmatpush3.bf16.msra.mxu0 %v1671_v1 }
 0x1e4   :  { %779 = vmatmul.mubr.f32.vlgmr.msra.gmra.mrb[18].mxu1 %v2425_v23  ;;  %912 = vmatmul.mubr.f32.vlgmr.msra.gmra.mrb[22].mxu0 %v2425_v23 }
 0x1e5   :  { %783 = vmatprep.mubr.f32.mxu1 %v2468_v44  ;;  %916 = vmatprep.mubr.f32.mxu0 %v2468_v44 }
 0x1e8   :  { %784 = vmatmul.mubr.f32.gmra.mrb[20].mxu1 %v2461_v39  ;;  %917 = vmatmul.mubr.f32.gmra.mrb[24].mxu0 %v2461_v39 }
 0x1e9   :  { %788 = vmatprep.mubr.f32.mxu1 %v2434_v29  ;;  %921 = vmatprep.mubr.f32.mxu0 %v2434_v29 }
 0x1ec   :  { %789 = vmatmul.mubr.f32.gmra.mrb[22].mxu1 %v2427_v24  ;;  %922 = vmatmul.mubr.f32.gmra.mrb[26].mxu0 %v2427_v24 }
 0x1ed   :  { %793 = vmatprep.mubr.f32.mxu1 %v2470_v45  ;;  %926 = vmatprep.mubr.f32.mxu0 %v2470_v45 }
 0x1f0   :  { %794 = vmatmul.mubr.f32.gmra.mrb[24].mxu1 %v2463_v40  ;;  %927 = vmatmul.mubr.f32.gmra.mrb[28].mxu0 %v2463_v40 }
 0x1f1   :  { %798 = vmatprep.mubr.f32.mxu1 %v2225_v52  ;;  %931 = vmatprep.mubr.f32.mxu0 %v2225_v52  ;;  %v968_v52 = vld [vmem:[%s2698_s6] sm:$0xff] }
 0x1f4   :  { %799 = vmatmul.mubr.f32.gmra.mrb[26].mxu1 %v2217_v47  ;;  %932 = vmatmul.mubr.f32.gmra.mrb[30].mxu0 %v2217_v47 }
 0x1f5   :  { %803 = vmatprep.mubr.f32.mxu1 %v2257_v2  ;;  %936 = vmatprep.mubr.f32.mxu0 %v2257_v2 }
 0x1f8   :  { %804 = vmatmul.mubr.f32.gmra.mrb[28].mxu1 %v2249_v61  ;;  %937 = vmatmul.mubr.f32.gmra.mrb[32].mxu0 %v2249_v61 }
 0x1f9   :  { %808 = vmatprep.mubr.f32.mxu1 %v415_v43  ;;  %941 = vmatprep.mubr.f32.mxu0 %v415_v43 }
 0x1fc   :  { %809 = vmatmul.mubr.f32.gmra.mrb[30].mxu1 %v414_v54  ;;  %942 = vmatmul.mubr.f32.gmra.mrb[34].mxu0 %v414_v54 }
 0x1fd   :  { %1394 = vmatprep.mubr.msk.f32.mxu1 %vm970_vm1, %v968_v52 }
 0x297   :  { %v1191_v47 = vpop.f32.mrb[4].mxu1  ;;  %v1244_v23 = vpop.f32.mrb[8].mxu0 }
 0x298   :  { %v1192_v24 = vpop.f32.mrb[5].mxu1  ;;  %v1245_v28 = vpop.f32.mrb[9].mxu0 }
 0x299   :  { %v1193_v2 = vadd.f32 %v1192_v24, %v1191_v47  ;;  %v1246_v29 = vadd.f32 %v1245_v28, %v1244_v23 }
 0x29b   :  { %v947_v39 = vmax.f32 %v1193_v2, %v1246_v29  ;;  %v1194_v40 = vpop.f32.mrb[6].mxu1  ;;  %v1247_v61 = vpop.f32.mrb[10].mxu0 }
 0x29c   :  { %v1195_v44 = vpop.f32.mrb[7].mxu1  ;;  %v1248_v45 = vpop.f32.mrb[11].mxu0 }
 0x29d   :  { %v1196_v4 = vadd.f32 %v1195_v44, %v1194_v40  ;;  %v1249_v5 = vadd.f32 %v1248_v45, %v1247_v61 }
 0x29f   :  { %v948_v6 = vmax.f32 %v1196_v4, %v1249_v5  ;;  %v1197_v7 = vpop.f32.mrb[8].mxu1  ;;  %v1250_v8 = vpop.f32.mrb[12].mxu0 }
 0x2a0   :  { %v1198_v9 = vpop.f32.mrb[9].mxu1  ;;  %v1251_v10 = vpop.f32.mrb[13].mxu0 }
 0x2a1   :  { %v1199_v11 = vadd.f32 %v1198_v9, %v1197_v7  ;;  %v1252_v12 = vadd.f32 %v1251_v10, %v1250_v8 }
 0x2a3   :  { %v949_v13 = vmax.f32 %v1199_v11, %v1252_v12  ;;  %v1200_v14 = vpop.f32.mrb[10].mxu1  ;;  %v1253_v15 = vpop.f32.mrb[14].mxu0 }
 0x2a4   :  { %v1201_v16 = vpop.f32.mrb[11].mxu1  ;;  %v1254_v17 = vpop.f32.mrb[15].mxu0 }
 0x2a5   :  { %v2655_v3 = vadd.f32 %v1201_v16, %v1200_v14  ;;  %v1255_v18 = vadd.f32 %v1254_v17, %v1253_v15 }
 0x2a7   :  { %v950_v19 = vmax.f32 %v2655_v3, %v1255_v18  ;;  %v1203_v20 = vpop.f32.mrb[12].mxu1  ;;  %v1256_v21 = vpop.f32.mrb[16].mxu0 }
 0x2a8   :  { %v1204_v22 = vpop.f32.mrb[13].mxu1  ;;  %v1257_v25 = vpop.f32.mrb[17].mxu0 }
 0x2a9   :  { %v2658_v26 = vadd.f32 %v1204_v22, %v1203_v20  ;;  %v2660_v27 = vadd.f32 %v1257_v25, %v1256_v21 }
 0x2ab   :  { %v951_v30 = vmax.f32 %v2658_v26, %v2660_v27  ;;  %v1206_v31 = vpop.f32.mrb[14].mxu1  ;;  %v1259_v32 = vpop.f32.mrb[18].mxu0 }
 0x2ac   :  { %v1207_v33 = vpop.f32.mrb[15].mxu1  ;;  %v1260_v34 = vpop.f32.mrb[19].mxu0 }
 0x2ad   :  { %v2664_v35 = vadd.f32 %v1207_v33, %v1206_v31  ;;  %v2666_v36 = vadd.f32 %v1260_v34, %v1259_v32 }
 0x2af   :  { %v952_v37 = vmax.f32 %v2664_v35, %v2666_v36  ;;  %v1209_v38 = vpop.f32.mrb[16].mxu1  ;;  %v1262_v41 = vpop.f32.mrb[20].mxu0 }
 0x2b0   :  { %v1210_v42 = vpop.f32.mrb[17].mxu1  ;;  %v1263_v43 = vpop.f32.mrb[21].mxu0 }
 0x2b1   :  { %v2670_v46 = vadd.f32 %v1210_v42, %v1209_v38  ;;  %v2672_v48 = vadd.f32 %v1263_v43, %v1262_v41 }
 0x2b3   :  { %v953_v49 = vmax.f32 %v2670_v46, %v2672_v48 }
 0x2b7   :  { %v1297_v50 = vpop.f32.mrb[18].mxu1  ;;  %v1350_v51 = vpop.f32.mrb[22].mxu0 }
 0x2b8   :  { %v1298_v53 = vpop.f32.mrb[19].mxu1  ;;  %v1351_v54 = vpop.f32.mrb[23].mxu0 }
 0x2b9   :  { %v1299_v55 = vadd.f32 %v1298_v53, %v1297_v50  ;;  %v1352_v56 = vadd.f32 %v1351_v54, %v1350_v51  ;;  %v969_v51 = vld [vmem:[%s2698_s6 + $0x8] sm:$0xff] }
 0x2bb   :  { %v954_v57 = vmax.f32 %v1299_v55, %v1352_v56  ;;  %v1300_v58 = vpop.f32.mrb[20].mxu1  ;;  %v1353_v59 = vpop.f32.mrb[24].mxu0 }
 0x2bc   :  { %v1301_v60 = vpop.f32.mrb[21].mxu1  ;;  %v1354_v62 = vpop.f32.mrb[25].mxu0 }
 0x2bd   :  { %v961_v63 = vmax.f32 %v947_v39, %v954_v57  ;;  %v1302_v0 = vadd.f32 %v1301_v60, %v1300_v58  ;;  %v1355_v1 = vadd.f32 %v1354_v62, %v1353_v59 }
 0x2bf   :  { %v955_v52 = vmax.f32 %v1302_v0, %v1355_v1  ;;  %v1303_v47 = vpop.f32.mrb[22].mxu1  ;;  %v1356_v23 = vpop.f32.mrb[26].mxu0 }
 0x2c0   :  { %v1304_v24 = vpop.f32.mrb[23].mxu1  ;;  %v1357_v28 = vpop.f32.mrb[27].mxu0 }
 0x2c1   :  { %v962_v2 = vmax.f32 %v948_v6, %v955_v52  ;;  %v1305_v29 = vadd.f32 %v1304_v24, %v1303_v47  ;;  %v1358_v40 = vadd.f32 %v1357_v28, %v1356_v23 }
 0x2c3   :  { %v956_v61 = vmax.f32 %v1305_v29, %v1358_v40  ;;  %v1306_v44 = vpop.f32.mrb[24].mxu1  ;;  %v1359_v45 = vpop.f32.mrb[28].mxu0  ;;  %v1673_v4 = vpack.c.bf16 %v962_v2, %v961_v63 }
 0x2c4   :  { %v1307_v5 = vpop.f32.mrb[25].mxu1  ;;  %v1360_v7 = vpop.f32.mrb[29].mxu0 }
 0x2c5   :  { %v963_v8 = vmax.f32 %v949_v13, %v956_v61  ;;  %v1308_v9 = vadd.f32 %v1307_v5, %v1306_v44  ;;  %v1361_v10 = vadd.f32 %v1360_v7, %v1359_v45  ;;  %1674 = vmatprep.subr.bf16.mxu1 %v1673_v4 }
 0x2c6   :  { %1676 = vmatpush3.bf16.msra.mxu1 %v1673_v4 }
 0x2c7   :  { %v957_v39 = vmax.f32 %v1308_v9, %v1361_v10  ;;  %v1309_v11 = vpop.f32.mrb[26].mxu1  ;;  %v1362_v12 = vpop.f32.mrb[30].mxu0 }
 0x2c8   :  { %v1310_v14 = vpop.f32.mrb[27].mxu1  ;;  %v1363_v15 = vpop.f32.mrb[31].mxu0 }
 0x2c9   :  { %v964_v16 = vmax.f32 %v950_v19, %v957_v39  ;;  %v1311_v6 = vadd.f32 %v1310_v14, %v1309_v11  ;;  %v1364_v17 = vadd.f32 %v1363_v15, %v1362_v12 }
 0x2cb   :  { %v958_v3 = vmax.f32 %v1311_v6, %v1364_v17  ;;  %v1312_v18 = vpop.f32.mrb[28].mxu1  ;;  %v1365_v20 = vpop.f32.mrb[32].mxu0  ;;  %v1677_v21 = vpack.c.bf16 %v964_v16, %v963_v8 }
 0x2cc   :  { %v1313_v22 = vpop.f32.mrb[29].mxu1  ;;  %v1366_v25 = vpop.f32.mrb[33].mxu0 }
 0x2cd   :  { %v965_v26 = vmax.f32 %v951_v30, %v958_v3  ;;  %v1314_v13 = vadd.f32 %v1313_v22, %v1312_v18  ;;  %v1367_v27 = vadd.f32 %v1366_v25, %v1365_v20  ;;  %1678 = vmatprep.subr.bf16.mxu1 %v1677_v21 }
 0x2ce   :  { %1680 = vmatpush3.bf16.msra.mxu1 %v1677_v21 }
 0x2cf   :  { %v959_v31 = vmax.f32 %v1314_v13, %v1367_v27  ;;  %v1315_v32 = vpop.f32.mrb[30].mxu1  ;;  %v1368_v33 = vpop.f32.mrb[34].mxu0 }
 0x2d0   :  { %v1316_v34 = vpop.f32.mrb[31].mxu1  ;;  %v1369_v38 = vpop.f32.mrb[35].mxu0 }
 0x2d1   :  { %v966_v19 = vmax.f32 %v952_v37, %v959_v31  ;;  %v1317_v41 = vadd.f32 %v1316_v34, %v1315_v32  ;;  %v1370_v42 = vadd.f32 %v1369_v38, %v1368_v33 }
 0x2d3   :  { %v960_v43 = vmax.f32 %v1317_v41, %v1370_v42  ;;  %v1681_v50 = vpack.c.bf16 %v966_v19, %v965_v26 }
 0x2d5   :  { %1682 = vmatprep.subr.bf16.mxu1 %v1681_v50  ;;  %v967_v30 = vmax.f32 %v953_v49, %v960_v43 }
 0x2d6   :  { %1684 = vmatpush3.bf16.msra.mxu1 %v1681_v50 }
 0x2d7   :  { %1392 = vmatprep.subr.mxu1 %v967_v30 }
 0x2da   :  { %1393 = vmatpush3.msra.mxu1 %v967_v30 }
 0x2db   :  { %1395 = vmatmul.mubr.msk.f32.vlgmr.msra.gmra.mrb[32].mxu1 %vm970_vm1, %v969_v51 }
 0x3ae   :  { %v1396_v35 = vpop.f32.mrb[32].mxu1 }
 0x3af   :  { %1054 = vst.msk [vmem:[%s2699_s7 + $0x8] sm:$0xff] %vm1052_vm2, %v1396_v35  ;;  %v1043_v36 = vpop.f32.mrb[33].mxu1 }
 0x3b0   :  { %1053 = vst.msk [vmem:[%s2699_s7] sm:$0xff] %vm1052_vm2, %v1043_v36 }

</bundles_post_ra>
